<compile_context>
chip_gen: v7x
topology: tpu7x:2x2x1
jax: 0.10.0
libtpu: 0.0.40
codegen_flags: <defaults>
</compile_context>

<pallas_src>
import functools

import jax
import jax.numpy as jnp
from jax import lax
from jax.experimental import pallas as pl
from jax.experimental.pallas import tpu as pltpu


# ------------------------------------------------------------------
# Pallas kernel
# ------------------------------------------------------------------

def _relpos_kernel(ri_ref, rj_ref, w_ref, b_ref, o_ref, *, max_rel_idx, n_rel_pos):
    """One (batch, N^2-tile) block of the relative positional encoding.

    ri_ref: (1, 1, TM) f32   residue_index[i] at flat position m = i*N + j
    rj_ref: (1, 1, TM) f32   residue_index[j] at flat position m = i*N + j
    w_ref : (attn_dim, n_rel_pos) bf16   (PyTorch nn.Linear weight layout)
    b_ref : (attn_dim, 1) f32
    o_ref : (1, attn_dim, TM) f32        out[0, c, m] = W[c, idx(m)] + b[c]
    """
    r_i = ri_ref[0]                                    # (1, TM)
    r_j = rj_ref[0]                                    # (1, TM)
    d = r_i - r_j                                      # d_ij, flattened over (i, j)

    # Nearest bin of v_bins = arange(n_rel_pos) - max_rel_idx.
    # Closed form of |d - v_bins|.argmin(-1) with first-min tie-breaking
    # (ties resolve to the lower bin value), then clamp to [-max, max].
    nearest = jnp.clip(jnp.ceil(d - 0.5),
                       -float(max_rel_idx), float(max_rel_idx))
    idx = (nearest + float(max_rel_idx)).astype(jnp.int32)     # (1, TM) in [0, n_rel_pos)

    # Transposed one-hot: one_hot_t[k, m] = (idx[m] == k)  ->  (n_rel_pos, TM)
    tm = d.shape[-1]
    bins = lax.broadcasted_iota(jnp.int32, (n_rel_pos, tm), 0)
    one_hot_t = (bins == idx).astype(jnp.bfloat16)             # exact in bf16 (0/1)

    # nn.Linear(one_hot) as a single lane-dense MXU matmul, f32 accumulation.
    out = jnp.dot(w_ref[...], one_hot_t, preferred_element_type=jnp.float32)
    o_ref[0] = out + b_ref[...]                                # bias broadcast over lanes


# ------------------------------------------------------------------
# Wrapper
# ------------------------------------------------------------------

def _pick_m_tile(m, max_tile=4096):
    """Largest multiple-of-128 tile of the flattened N*N axis (or the full axis)."""
    if m <= max_tile:
        return m
    for t in range(max_tile, 0, -128):
        if m % t == 0:
            return t
    # TODO(synk): N*N with no multiple-of-128 divisor is not tiled (single full block).
    return m


def relative_positional_encoding(residue_index, weight, bias, *, max_rel_idx=32):
    """Pallas TPU forward of RelativePositionalEncoding.

    residue_index: (B, N) float/int positions.
    weight: (attn_dim, n_rel_pos), bias: (attn_dim,)  -- PyTorch nn.Linear layout.
    Returns (B, N, N, attn_dim) float32.
    """
    B, N = residue_index.shape
    attn_dim, n_rel_pos = weight.shape
    assert n_rel_pos == 2 * max_rel_idx + 1
    M = N * N
    TM = _pick_m_tile(M)

    ri = residue_index.astype(jnp.float32)
    # Host-side layout plumbing only: flat row/col broadcasts so d_ij is already
    # lane-major inside the kernel (no in-kernel transpose / reshape / slicing).
    ri_row = jnp.repeat(ri, N, axis=-1).reshape(B, 1, M)    # value r[i] at m = i*N + j
    ri_col = jnp.tile(ri, (1, N)).reshape(B, 1, M)          # value r[j] at m = i*N + j
    w_bf16 = weight.astype(jnp.bfloat16)                    # MXU operand dtype
    bias2d = bias.reshape(attn_dim, 1).astype(jnp.float32)

    kernel = functools.partial(_relpos_kernel, max_rel_idx=max_rel_idx,
                               n_rel_pos=n_rel_pos)
    out = pl.pallas_call(
        kernel,
        out_shape=jax.ShapeDtypeStruct((B, attn_dim, M), jnp.float32),
        grid=(B, M // TM),
        in_specs=[
            pl.BlockSpec((1, 1, TM), lambda b, m: (b, 0, m)),           # r_i (flat)
            pl.BlockSpec((1, 1, TM), lambda b, m: (b, 0, m)),           # r_j (flat)
            pl.BlockSpec((attn_dim, n_rel_pos), lambda b, m: (0, 0)),   # W (bf16)
            pl.BlockSpec((attn_dim, 1), lambda b, m: (0, 0)),           # bias
        ],
        out_specs=pl.BlockSpec((1, attn_dim, TM), lambda b, m: (b, 0, m)),
        compiler_params=pltpu.CompilerParams(
            dimension_semantics=("parallel", "parallel")),
    )(ri_row, ri_col, w_bf16, bias2d)

    # Wrapper-side layout only: (B, attn_dim, N*N) -> (B, N, N, attn_dim).
    return out.reshape(B, attn_dim, N, N).transpose(0, 2, 3, 1)


# ------------------------------------------------------------------
# Pure-JAX reference (literal translation of the PyTorch forward)
# ------------------------------------------------------------------

def reference(residue_index, weight, bias, *, max_rel_idx=32):
    n_rel_pos = 2 * max_rel_idx + 1
    ri = residue_index.astype(jnp.float32)
    d_ij = ri[..., None] - ri[..., None, :]                            # (B, N, N)
    v_bins = (jnp.arange(n_rel_pos) - max_rel_idx).astype(jnp.float32)
    idxs = jnp.argmin(jnp.abs(d_ij[..., None] - v_bins[None, None]), axis=-1)
    p_ij = jax.nn.one_hot(idxs, n_rel_pos, dtype=jnp.float32)          # (B, N, N, 65)
    return p_ij @ weight.T.astype(jnp.float32) + bias.astype(jnp.float32)


# ------------------------------------------------------------------

if __name__ == "__main__":
    attn_dim, max_rel_idx = 8, 32            # module defaults
    n_rel_pos = 2 * max_rel_idx + 1          # 65
    B, N = 2, 16                             # batch, residues

    key = jax.random.PRNGKey(0)
    k1, k2, k3 = jax.random.split(key, 3)
    # Integer residue positions in [0, 96): many |d_ij| > 32 so clamping is exercised.
    residue_index = jax.random.randint(k1, (B, N), 0, 96).astype(jnp.float32)
    weight = jax.random.normal(k2, (attn_dim, n_rel_pos), jnp.float32) / jnp.sqrt(
        float(n_rel_pos))
    # Snap weights to bf16-representable values so the bf16 MXU gather is exact and the
    # self-check can use a tight tolerance.
    weight = weight.astype(jnp.bfloat16).astype(jnp.float32)
    bias = 0.1 * jax.random.normal(k3, (attn_dim,), jnp.float32)

    out = relative_positional_encoding(residue_index, weight, bias,
                                       max_rel_idx=max_rel_idx)
    out = jax.block_until_ready(out)

    ref = reference(residue_index, weight, bias, max_rel_idx=max_rel_idx)
    assert out.shape == (B, N, N, attn_dim), out.shape
    assert jnp.allclose(out, ref, atol=1e-5, rtol=1e-5), (
        float(jnp.max(jnp.abs(out - ref))))

    print("KERNEL_OK")
</pallas_src>

<mosaic_0001>
module attributes {stable_mosaic.version = 11 : i64} {
  func.func @_relpos_kernel(%arg0: i32, %arg1: i32, %arg2: memref<1x1x256xf32, #tpu.memory_space<vmem>>, %arg3: memref<1x1x256xf32, #tpu.memory_space<vmem>>, %arg4: memref<8x65xbf16, #tpu.memory_space<vmem>>, %arg5: memref<8x1xf32, #tpu.memory_space<vmem>>, %arg6: memref<1x8x256xf32, #tpu.memory_space<vmem>>) attributes {dimension_semantics = [#tpu.dimension_semantics<parallel>, #tpu.dimension_semantics<parallel>], iteration_bounds = array<i64: 2, 1>, scalar_prefetch = 0 : i64, scratch_operands = 0 : i64, tpu.core_type = #tpu.core_type<tc>, window_params = [{transform_indices = @transform_0, window_bounds = array<i64: 1, 1, 256>}, {transform_indices = @transform_1, window_bounds = array<i64: 1, 1, 256>}, {pipeline_mode = #tpu.pipeline_mode<synchronous>, transform_indices = @transform_2, window_bounds = array<i64: 8, 65>}, {pipeline_mode = #tpu.pipeline_mode<synchronous>, transform_indices = @transform_3, window_bounds = array<i64: 8, 1>}, {transform_indices = @transform_4, window_bounds = array<i64: 1, 8, 256>}]} {
    %c0 = arith.constant 0 : index
    %c0_0 = arith.constant 0 : index
    %c0_1 = arith.constant 0 : index
    %0 = vector.load %arg2[%c0, %c0_0, %c0_1] : memref<1x1x256xf32, #tpu.memory_space<vmem>>, vector<1x1x256xf32>
    %1 = vector.shape_cast %0 : vector<1x1x256xf32> to vector<1x256xf32>
    %c0_2 = arith.constant 0 : index
    %c0_3 = arith.constant 0 : index
    %c0_4 = arith.constant 0 : index
    %2 = vector.load %arg3[%c0_2, %c0_3, %c0_4] : memref<1x1x256xf32, #tpu.memory_space<vmem>>, vector<1x1x256xf32>
    %3 = vector.shape_cast %2 : vector<1x1x256xf32> to vector<1x256xf32>
    %4 = arith.subf %1, %3 : vector<1x256xf32>
    %cst = arith.constant 5.000000e-01 : f32
    %5 = vector.broadcast %cst : f32 to vector<1x256xf32>
    %6 = arith.subf %4, %5 : vector<1x256xf32>
    %7 = math.ceil %6 : vector<1x256xf32>
    %cst_5 = arith.constant -3.200000e+01 : f32
    %cst_6 = arith.constant 3.200000e+01 : f32
    %8 = vector.broadcast %cst_5 : f32 to vector<1x256xf32>
    %9 = arith.maximumf %8, %7 : vector<1x256xf32>
    %10 = vector.broadcast %cst_6 : f32 to vector<1x256xf32>
    %11 = arith.minimumf %10, %9 : vector<1x256xf32>
    %cst_7 = arith.constant 3.200000e+01 : f32
    %12 = vector.broadcast %cst_7 : f32 to vector<1x256xf32>
    %13 = arith.addf %11, %12 : vector<1x256xf32>
    %14 = arith.fptosi %13 : vector<1x256xf32> to vector<1x256xi32>
    %15 = tpu.iota {dimensions = array<i32: 0>} : vector<65x256xi32>
    %16 = vector.broadcast %14 : vector<1x256xi32> to vector<65x256xi32>
    %17 = arith.cmpi eq, %15, %16 : vector<65x256xi32>
    %18 = arith.extui %17 : vector<65x256xi1> to vector<65x256xi32>
    %19 = arith.sitofp %18 : vector<65x256xi32> to vector<65x256xf32>
    %20 = arith.truncf %19 : vector<65x256xf32> to vector<65x256xbf16>
    %c0_8 = arith.constant 0 : index
    %c0_9 = arith.constant 0 : index
    %21 = vector.load %arg4[%c0_8, %c0_9] : memref<8x65xbf16, #tpu.memory_space<vmem>>, vector<8x65xbf16>
    %cst_10 = arith.constant dense<0.000000e+00> : vector<8x256xf32>
    %22 = tpu.matmul %21, %20, %cst_10 {dimension_numbers = #tpu.dot_dimension_numbers<[1], [0], [0], [1], [0, 0, 1, 1], [], []>} : vector<8x65xbf16>, vector<65x256xbf16>, vector<8x256xf32> -> vector<8x256xf32>
    %c0_11 = arith.constant 0 : index
    %c0_12 = arith.constant 0 : index
    %23 = vector.load %arg5[%c0_11, %c0_12] : memref<8x1xf32, #tpu.memory_space<vmem>>, vector<8x1xf32>
    %24 = vector.broadcast %23 : vector<8x1xf32> to vector<8x256xf32>
    %25 = arith.addf %22, %24 : vector<8x256xf32>
    %c0_13 = arith.constant 0 : index
    %c0_14 = arith.constant 0 : index
    %c0_15 = arith.constant 0 : index
    %26 = vector.load %arg6[%c0_13, %c0_14, %c0_15] : memref<1x8x256xf32, #tpu.memory_space<vmem>>, vector<1x8x256xf32>
    %27 = vector.shape_cast %26 : vector<1x8x256xf32> to vector<8x256xf32>
    %28 = vector.shape_cast %25 : vector<8x256xf32> to vector<1x8x256xf32>
    tpu.vector_store %arg6[%c0_13, %c0_14, %c0_15], %28 {strides = array<i32>} : memref<1x8x256xf32, #tpu.memory_space<vmem>>, vector<1x8x256xf32>,
    return
  }
  func.func @transform_0(%arg0: i32, %arg1: i32) -> (i32, i32, i32) {
    %c0_i32 = arith.constant 0 : i32
    %c0_i32_0 = arith.constant 0 : i32
    return %arg0, %c0_i32, %arg1 : i32, i32, i32
  }
  func.func @transform_1(%arg0: i32, %arg1: i32) -> (i32, i32, i32) {
    %c0_i32 = arith.constant 0 : i32
    %c0_i32_0 = arith.constant 0 : i32
    return %arg0, %c0_i32, %arg1 : i32, i32, i32
  }
  func.func @transform_2(%arg0: i32, %arg1: i32) -> (i32, i32) {
    %c0_i32 = arith.constant 0 : i32
    %c0_i32_0 = arith.constant 0 : i32
    %c0_i32_1 = arith.constant 0 : i32
    return %c0_i32, %c0_i32_0 : i32, i32
  }
  func.func @transform_3(%arg0: i32, %arg1: i32) -> (i32, i32) {
    %c0_i32 = arith.constant 0 : i32
    %c0_i32_0 = arith.constant 0 : i32
    %c0_i32_1 = arith.constant 0 : i32
    return %c0_i32, %c0_i32_0 : i32, i32
  }
  func.func @transform_4(%arg0: i32, %arg1: i32) -> (i32, i32, i32) {
    %c0_i32 = arith.constant 0 : i32
    %c0_i32_0 = arith.constant 0 : i32
    return %arg0, %c0_i32, %arg1 : i32, i32, i32
  }
}

</mosaic_0001>

<bundles_post_ra>
// kernel: tpu_custom_call.1
= control target key start
LH: loop header
LB: loop body
LE: loop exit
PB: predicated region body
PF: predicated region fallthrough
CT: control target
= control target key end

     0   :  { %9 = vsyncpa [#allocation3], 0  ;;  %s862_s0 = inlined_call_operand.vmem [shape: f32[2,1,256], index: 0, kind: input, shape index: {}]   ;;  %s863_s1 = inlined_call_operand.vmem [shape: f32[2,1,256], index: 1, kind: input, shape index: {}]   ;;  %s864_s2 = inlined_call_operand.vmem [shape: bf16[8,65], index: 2, kind: input, shape index: {}]   ;;  %s865_s3 = inlined_call_operand.vmem [shape: f32[8,1], index: 3, kind: input, shape index: {}]   ;;  %s866_s4 = inlined_call_operand.hbm [shape: f32[2,8,256], index: 4, kind: output, shape index: {}]  }
   0x1   :  { %11 = vsyncpa [#allocation3 + $0x1], 0  ;;  %s738_s15 = smov 0   ;;  %s740_s16 = smov 0  }
   0x2   :  { %s742_s17 = smov 0   ;;  %s744_s18 = smov 0  }
   0x3   :  { %s746_s19 = smov 0   ;;  %s748_s20 = smov 0  }
   0x4 LB: > { %s517_s21 = sadd.s32 4294967295, %s707_s20   ;;  %s518_s22 = sadd.s32 4294967294, %s707_s20   ;;  %s707_s20 = sphi %s748_s20, %s17_s20   ;;  %s703_s19 = sphi %s746_s19, %s873_s19   ;;  %s699_s18 = sphi %s744_s18, %s872_s18   ;;  %s695_s17 = sphi %s742_s17, %s871_s17   ;;  %s691_s16 = sphi %s740_s16, %s870_s16   ;;  %s687_s15 = sphi %s738_s15, %s869_s15  }
   0x5   : > { %s29_s23 = sadd.s32 1, %s703_s19  ;;  %s136_s24 = sadd.s32 1, %s695_s17 }
   0x6   : > { %p31_p0 = scmp.ge.s32.totalorder %s29_s23, 2  ;;  %p146_p1 = scmp.ne.s32.totalorder %s695_s17, %s691_s16 }
   0x7   : > { %p147_p2 = scmp.eq.s32.totalorder %s517_s21, 1  ;;  %p152_p3 = scmp.ne.s32.totalorder %s691_s16, %s687_s15 }
   0x8   : > { %s875_s23 = smov (%p31_p0, %s29_s23), 0  ;;  %p153_p5 = scmp.eq.s32.totalorder %s518_s22, 1 }
   0x9   : > { %p778_p4 = por %p147_p2, %p146_p1  ;;  %s131_s26 = ssub.s32 %s703_s19, %s875_s23 }
   0xa   : > { %p521_p6 = scmp.ge.s32.totalorder %s707_s20, 1  ;;  %p134_p7 = scmp.eq.s32.totalorder %s131_s26, 0 }
   0xb   : > { %p785_p8 = por %p153_p5, %p152_p3  ;;  %p201_p9 = scmp.lt.s32.totalorder %s707_s20, 3 }
   0xc   : > { %s791_s28 = scalar_select %p134_p7, %s695_s17, %s136_s24  }
   0xd   : > { %p202_p10 = pnand %p521_p6, %p201_p9 }
   0xe   : > { %p239_p11 = scmp.lt.s32.totalorder (!%p202_p10), %s699_s18, 1  ;;  %v350_v0 = vld [vmem:[%s865_s3] sm:$0xff] (!%p202_p10)  ;;  %v709_v1 = vmov (!%p202_p10), 0   ;;  %v267_v6 = vlaneseq (!%p202_p10)  ;;  %v710_v23 = vmov (!%p202_p10), 1.0|1.0   ;;  %v711_v26 = vmov (!%p202_p10), 0.0  }
   0xf   : > { %205 = sbr.rel (%p202_p10) target bundleno = 295 (0x127), region = 36  ;;  %401 = vmatprep.mubr.bf16.mxu0 (!%p202_p10), %v709_v1  ;;  %628 = vset.pattern.permute.xlu0 (!%p202_p10), %v709_v1  ;;  %v349_v34 = vld [vmem:[%s864_s2] sm:$0xf] (!%p202_p10)  ;;  %s235_s21 = sand.u32 (!%p202_p10), 1, %s691_s16  }
  0x10   : > { %353 = vperm.xlu0 (!%p202_p10), %628, %v350_v0   ;;  %v268_v9 = vshrl.u32 (!%p202_p10), %v267_v6, 7  ;;  %s522_s22 = sshll.u32 (!%p202_p10), %s235_s21, 4  ;;  %s567_s24 = sshll.u32 (!%p202_p10), %s699_s18, 8 }
  0x11   : > { %s237_s26 = scalar_lea.vmem (!%p202_p10), [#allocation2], %s522_s22  ;;  %s712_s8 = smov (!%p202_p10), [#allocation2]  }
  0x12   : > { %v283_v12 = vsub.s32 (!%p202_p10), 1, %v268_v9  ;;  %v279_v13 = vsub.s32 (!%p202_p10), 0, %v268_v9  ;;  %v269_v15 = vadd.s32 (!%p202_p10), 8, %v268_v9  ;;  %v270_v16 = vadd.s32 (!%p202_p10), 16, %v268_v9  ;;  %s429_s29 = sshll.u32 (!%p202_p10), %s237_s26, 4  ;;  %s817_s29 = int_to_ptr.vmem [resolvable:$true] %s429_s29 }
  0x13   : > { %v271_v17 = vadd.s32 (!%p202_p10), 24, %v268_v9  ;;  %v272_v20 = vadd.s32 (!%p202_p10), 32, %v268_v9  ;;  %v273_v21 = vadd.s32 (!%p202_p10), 40, %v268_v9  ;;  %v276_v22 = vadd.s32 (!%p202_p10), 64, %v268_v9  ;;  %s629_s7 = scalar_lea.vmem (!%p202_p10), %s817_s29, 256 }
  0x14   : > { %v274_v24 = vadd.s32 (!%p202_p10), 48, %v268_v9  ;;  %v275_v25 = vadd.s32 (!%p202_p10), 56, %v268_v9  ;;  %p630_p12 = scmp.ne.s32.totalorder (!%p202_p10), %s817_s29, %s629_s7 }
  0x16   : > { %s240_s5 = scalar_select %p239_p11, %s699_s18, 1 }
  0x17   : > { %s413_s18 = scalar_lea.sflag [#allocation3], %s235_s21  ;;  %p631_p13 = pnand %p630_p12, %p778_p4 }
  0x18   : > { %s523_s6 = sshll.u32 %s240_s5, 1 }
  0x19   : > { %s245_s9 = scalar_lea.vmem %s862_s0, %s523_s6  ;;  %s254_s12 = scalar_lea.vmem %s863_s1, %s523_s6 }
  0x1a   : > { %v258_v2 = vld [vmem:[%s245_s9] sm:$0x3]  ;;  %s815_s6 = scalar_lea.hbm %s866_s4, %s567_s24  ;;  %p632_p0 = pneg %p631_p13 }
  0x1b   : > { %v259_v3 = vld [vmem:[%s254_s12] sm:$0x3]  ;;  %s633_s9 = sshll.u32 %s712_s8, 4  ;;  %s634_s9 = int_to_ptr.vmem [resolvable:$false] %s633_s9 }
  0x1c   : > { %v260_v4 = vsub.f32 %v258_v2, %v259_v3  ;;  %s635_s10 = scalar_lea.vmem %s634_s9, 512  ;;  %p636_p1 = scmp.lt.s32.totalorder %s817_s29, %s634_s9 }
  0x1d   : > { %p637_p2 = scmp.lt.s32.totalorder %s635_s10, %s629_s7 }
  0x1e   : > { %v525_v5 = vadd.f32 -0.5, %v260_v4 }
  0x1f   : > { %p638_p3 = por %p637_p2, %p636_p1 }
  0x20   : > { %v262_v7 = vceil.f32 %v525_v5 }
  0x21   : > { %p639_p5 = pnand %p638_p3, %p632_p0 }
  0x22   : > { %v526_v8 = vclamps-f32 %v262_v7, 32.0 }
  0x24   : > { %v265_v10 = vadd.f32 32.0, %v526_v8 }
  0x26   : > { %v568_v11 = vtrunc.f32 %v265_v10 }
  0x28   : > { %v569_v14 = vcvt.f32.s32 %v568_v11 }
  0x2a   : > { %v284_v18 = vrot.slane %v569_v14, %v283_v12  ;;  %v280_v19 = vrot.slane %v569_v14, %v279_v13 }
  0x2c   : > { %vm286_vm0 = vcmp.eq.s32.totalorder %v268_v9, %v284_v18  ;;  %vm288_vm1 = vcmp.eq.s32.totalorder %v269_v15, %v284_v18  ;;  %vm285_vm2 = vcmp.eq.s32.totalorder %v268_v9, %v280_v19  ;;  %vm287_vm3 = vcmp.eq.s32.totalorder %v269_v15, %v280_v19 }
  0x2d   : > { %vm545_vm4 = vmpackc.low %vm288_vm1, %vm286_vm0  ;;  %vm290_vm5 = vcmp.eq.s32.totalorder %v270_v16, %v284_v18  ;;  %vm292_vm6 = vcmp.eq.s32.totalorder %v271_v17, %v284_v18  ;;  %vm289_vm7 = vcmp.eq.s32.totalorder %v270_v16, %v280_v19  ;;  %vm291_vm8 = vcmp.eq.s32.totalorder %v271_v17, %v280_v19 }
  0x2e   : > { %546 = vmatprep.subr.msk.bf16.mxu0 %vm545_vm4, %v710_v23  ;;  %vm547_vm9 = vmpackc.low %vm287_vm3, %vm285_vm2  ;;  %vm294_vm10 = vcmp.eq.s32.totalorder %v272_v20, %v284_v18  ;;  %vm296_vm11 = vcmp.eq.s32.totalorder %v273_v21, %v284_v18  ;;  %vm302_vm14 = vcmp.eq.s32.totalorder %v276_v22, %v284_v18  ;;  %vm293_vm0 = vcmp.eq.s32.totalorder %v272_v20, %v280_v19 }
  0x2f   : > { %548 = vmatpush1.bf16.msk.msra.mxu0 %vm547_vm9, %v710_v23  ;;  %vm549_vm12 = vmpackc.low %vm292_vm6, %vm290_vm5  ;;  %vm295_vm1 = vcmp.eq.s32.totalorder %v273_v21, %v280_v19  ;;  %v544_v27 = vsel %vm302_vm14, 1.0, %v711_v26  ;;  %vm301_vm4 = vcmp.eq.s32.totalorder %v276_v22, %v280_v19  ;;  %vm298_vm2 = vcmp.eq.s32.totalorder %v274_v24, %v284_v18 }
  0x30   : > { %550 = vmatprep.subr.msk.bf16.mxu0 %vm549_vm12, %v710_v23  ;;  %vm551_vm13 = vmpackc.low %vm291_vm8, %vm289_vm7  ;;  %vm300_vm3 = vcmp.eq.s32.totalorder %v275_v25, %v284_v18  ;;  %vm360_vm9 = vcmask 1040384   ;;  %v348_v28 = vpack.c.bf16 %v544_v27, %v544_v27  ;;  %v543_v29 = vsel %vm301_vm4, 1.0, %v711_v26 }
  0x31   : > { %vm553_vm15 = vmpackc.low %vm296_vm11, %vm294_vm10  ;;  %vm297_vm12 = vcmp.eq.s32.totalorder %v274_v24, %v280_v19  ;;  %vm299_vm7 = vcmp.eq.s32.totalorder %v275_v25, %v280_v19  ;;  %v362_v30 = vsel %vm360_vm9, 65535, %v709_v1  ;;  %v347_v31 = vpack.c.bf16 %v543_v29, %v543_v29 }
  0x32   : > { %vm555_vm5 = vmpackc.low %vm295_vm1, %vm293_vm0  ;;  %v367_v32 = vand.u32 %v362_v30, %v348_v28  ;;  %vm356_vm10 = vcmask 531456  }
  0x33   : > { %552 = vmatpush1.bf16.msk.msra.mxu0 %vm551_vm13, %v710_v23  ;;  %vm557_vm6 = vmpackc.low %vm300_vm3, %vm298_vm2  ;;  %v364_v33 = vand.u32 %v362_v30, %v347_v31 }
  0x34   : > { %554 = vmatprep.subr.msk.bf16.mxu0 %vm553_vm15, %v710_v23  ;;  %vm559_vm8 = vmpackc.low %vm299_vm7, %vm297_vm12 }
  0x37   : > { %556 = vmatpush1.bf16.msk.msra.mxu0 %vm555_vm5, %v710_v23 }
  0x38   : > { %558 = vmatprep.subr.msk.bf16.mxu0 %vm557_vm6, %v710_v23 }
  0x3b   : > { %560 = vmatpush1.bf16.msk.msra.mxu0 %vm559_vm8, %v710_v23 }
  0x3c   : > { %377 = vmatprep.subr.bf16.mxu0 %v367_v32 }
  0x3f   : > { %378 = vmatpush1.bf16.msra.mxu0 %v364_v33 }
  0x42   : > { %561 = vmatmul.mubr.msk.bf16.vlgmr.msra.gmra.mrb[0].mxu0 %vm356_vm10, %v349_v34 }
  0x8f   : > { %v354_v35 = vpop.permute.xlu0 %353 }
 0x115   : > { %v403_v36 = vpop.f32.mrb[0].mxu0 }
 0x116   : > { %v404_v37 = vadd.f32 %v403_v36, %v354_v35  ;;  %v405_v38 = vpop.f32.mrb[1].mxu0 }
 0x117   : > { %v406_v39 = vadd.f32 %v405_v38, %v354_v35  ;;  %v407_v40 = vpop.f32.mrb[2].mxu0 }
 0x118   : > { %410 = vst [vmem:[%s237_s26] sm:$0xff] %v404_v37  ;;  %v408_v41 = vpop.f32.mrb[3].mxu0 }
 0x119   : > { %411 = vst [vmem:[%s237_s26 + $0x8] sm:$0xff] %v406_v39 }
 0x11a   : > { %642 = shalt.err (!%p639_p5)
}
 0x11b   : > { %s643_s11 = scalar_lea.hbm %s815_s6, 256  ;;  %s647_s14 = scalar_lea.hbm %s866_s4, 512 }
 0x11c   : > { %p644_p6 = scmp.ne.s32.totalorder %s815_s6, %s643_s11  ;;  %p648_p10 = scmp.lt.u32.totalorder %s815_s6, %s866_s4 }
 0x11d   : > { %p649_p11 = scmp.lt.u32.totalorder %s647_s14, %s643_s11  ;;  %p651_p13 = scmp.lt.u32.totalorder %s643_s11, %s815_s6 }
 0x11e   : > { %p645_p7 = pnand %p644_p6, %p778_p4 }
 0x11f   : > { %p650_p12 = por %p649_p11, %p648_p10 }
 0x120   : > { %p646_p9 = pneg %p645_p7 }
 0x121   : > { %p652_p0 = por %p651_p13, %p650_p12 }
 0x123   : > { %p653_p1 = pnand %p652_p0, %p646_p9 }
 0x125   : > { %656 = shalt.err (!%p653_p1)
}
 0x126   : > { %570 = dma.vmem_to_hbm [thread:$0]  (%p778_p4), %s817_s29, 256, %s815_s6, %s413_s18  }
 0x127 PF: > { %p576_p2 = scmp.ge.s32.totalorder %s707_s20, 2  ;;  %s441_s24 = sand.u32 1, %s687_s15  }
 0x128   : > { %s442_s26 = scalar_lea.sflag [#allocation3], %s441_s24 }
 0x129   : > { %p573_p3 = pnand %p576_p2, %p785_p8 }
 0x12b   : > { %682 = dma.done.wait (!%p573_p3), %s442_s26, 256  }
 0x12c   : > { %684 = vsyncadd (!%p573_p3), %s442_s26, 4294967040  ;;  %s17_s20 = sadd.s32 1, %s707_s20   ;;  %s869_s15 = smov %s691_s16 }
 0x12d   : > { %p14_p5 = scmp.ge.s32.totalorder %s17_s20, 4   ;;  %s870_s16 = smov %s695_s17 }
 0x12e   : > { %s871_s17 = smov %s791_s28  ;;  %s872_s18 = smov %s703_s19 }
 0x12f   : > { %s873_s19 = smov %s875_s23  ;;  %16 = sbr.rel (!%p14_p5) target bundleno = 4 (0x4), region = 74 }
 0x136   :  { %447 = vsyncpa [#allocation3], 1 }
 0x137   :  { %449 = vsyncpa [#allocation3 + $0x1], 1 }

</bundles_post_ra>
